<compile_context>
chip_gen: v6e
topology: v6e:2x2x1
jax: 0.10.0
libtpu: 0.0.40
codegen_flags: <defaults>
</compile_context>

<pallas_src>
import functools

import jax
import jax.numpy as jnp
from jax.experimental import pallas as pl
from jax.experimental.pallas import tpu as pltpu


def _round_up(x, m):
    return ((x + m - 1) // m) * m


def _ceil_div(a, b):
    return -(-a // b)


def _tpu_info():
    try:
        return pltpu.get_tpu_info()
    except Exception:
        return None


def _default_num_splits():
    info = _tpu_info()
    if info is not None:
        for attr in ("num_cores", "core_count", "num_tensorcores",
                     "tensor_core_count", "num_tensor_cores"):
            v = getattr(info, attr, None)
            try:
                v = int(v)
            except (TypeError, ValueError):
                continue
            if v > 0:
                return v
    try:
        kind = jax.devices()[0].device_kind.lower()
        if "v7" in kind:
            return 2
    except Exception:
        pass
    return 1


def _label_smoothing_kernel(*refs, num_classes, smoothing, has_weight,
                            n_total, block_n):
    if has_weight:
        pred_ref, tgt_ref, w_ref, out_ref, acc_ref = refs
    else:
        pred_ref, tgt_ref, out_ref, acc_ref = refs
        w_ref = None

    s = pl.program_id(0)            # batch split (parallel / megacore axis)
    i = pl.program_id(1)            # step within split (sequential)
    steps = pl.num_programs(1)

    @pl.when(i == 0)
    def _():
        acc_ref[...] = jnp.zeros_like(acc_ref)

    confidence = 1.0 - smoothing
    off_value = smoothing / max(num_classes - 1, 1)

    # log_softmax along the class (lane) dim; math in f32 regardless of the
    # HBM dtype of pred (bf16 inputs keep bf16 DMA traffic).
    x = pred_ref[...].astype(jnp.float32)                        # (block_n, C)
    m = jnp.max(x, axis=-1, keepdims=True)
    lse = jnp.log(jnp.sum(jnp.exp(x - m), axis=-1, keepdims=True)) + m
    logp = x - lse

    # per-class weight applied to the log-probs (matches the PyTorch module:
    # pred.log_softmax(dim) * weight.unsqueeze(0)); compiled out when absent.
    if has_weight:
        logp = logp * w_ref[...].astype(jnp.float32)             # (1, C) bcast

    # smoothed NLL without materializing true_dist:
    #   sum_c(true_dist * logp) = off * sum_c(logp) + (conf - off) * logp[target]
    cls_ids = jax.lax.broadcasted_iota(jnp.int32, (1, num_classes), 1)  # (1, C)
    onehot = cls_ids == tgt_ref[...]                             # (block_n, C)
    sel = jnp.sum(jnp.where(onehot, logp, 0.0), axis=-1, keepdims=True)
    if smoothing > 0.0:
        total = jnp.sum(logp, axis=-1, keepdims=True)
        row_loss = -(off_value * total + (confidence - off_value) * sel)
    else:
        row_loss = -sel                                          # (block_n, 1)

    # accumulate; the padding-row mask only runs on tiles that contain padding
    row0 = (s * steps + i) * block_n

    @pl.when(row0 + block_n <= n_total)
    def _():
        acc_ref[...] += row_loss

    @pl.when(row0 + block_n > n_total)
    def _():
        rows = row0 + jax.lax.broadcasted_iota(jnp.int32, (block_n, 1), 0)
        acc_ref[...] += jnp.where(rows < n_total, row_loss, 0.0)

    @pl.when(i == steps - 1)
    def _():
        partial = jnp.sum(acc_ref[...]) / jnp.float32(n_total)
        # lane-dense (8,128) block per split; every element carries the split's
        # partial mean, the wrapper sums one lane per split.
        out_ref[...] = jnp.full(out_ref.shape, partial, out_ref.dtype)


def label_smoothing_loss(pred, target, *, num_classes, smoothing=0.0,
                         weight=None, block_n=None, num_splits=None):
    """pred: (N, C) float logits, target: (N,) int labels -> scalar loss."""
    assert 0.0 <= smoothing < 1.0
    N, C = pred.shape
    assert C == num_classes

    itemsize = jnp.dtype(pred.dtype).itemsize
    sub = 8 * max(1, 4 // itemsize)      # sublane pack: f32->8, bf16->16, i8->32

    # --- VMEM budget (128 MiB v5e/v6e, 64 MiB per-TC v7x) --------------------
    info = _tpu_info()
    vmem_cap = 0
    if info is not None:
        try:
            vmem_cap = int(getattr(info, "vmem_capacity_bytes", 0) or 0)
        except (TypeError, ValueError):
            vmem_cap = 0
    if vmem_cap <= 0:
        vmem_cap = 64 * 1024 * 1024       # conservative fallback (v7x per-TC)
    vmem_limit = (vmem_cap * 3) // 4      # scoped-VMEM ceiling for the compiler

    if block_n is None:
        # Per-row VMEM footprint:
        #   double-buffered pred tile .......... 2 * C * itemsize
        #   ~4 full-tile f32 temporaries ....... 16 * C   (x_f32, exp, logp, select)
        #   (block_n,1) target (2 bufs) + acc .. 3 * 512  (lane-padded to 128)
        per_row = 2 * C * itemsize + 16 * C + 3 * 512
        budget = (vmem_limit * 3) // 4    # extra headroom for compiler scratch
        bn_vmem = max(sub, budget // per_row)
        # Bytes-based tile target (not a row cap): ~16 MiB of pred per grid
        # step amortizes the ~0.35 us/step pipeline overhead.
        bn_bytes = max(sub, (16 * 1024 * 1024) // (C * itemsize))
        block_n = max(sub, (min(bn_vmem, bn_bytes) // sub) * sub)

    if num_splits is None:
        num_splits = _default_num_splits()
    num_splits = max(1, int(num_splits))

    rows_per_split = _round_up(max(1, _ceil_div(N, num_splits)), sub)
    block_n = max(sub, min((block_n // sub) * sub, rows_per_split))
    steps_per_split = _ceil_div(rows_per_split, block_n)
    padded_N = num_splits * steps_per_split * block_n

    if padded_N != N:
        pred = jnp.pad(pred, ((0, padded_N - N), (0, 0)))
        target = jnp.pad(target, ((0, padded_N - N),))

    target2d = target.reshape(padded_N, 1).astype(jnp.int32)
    has_weight = weight is not None

    kernel = functools.partial(
        _label_smoothing_kernel,
        num_classes=num_classes, smoothing=float(smoothing),
        has_weight=has_weight, n_total=N, block_n=block_n)

    in_specs = [
        pl.BlockSpec((block_n, C), lambda s, i: (s * steps_per_split + i, 0)),
        pl.BlockSpec((block_n, 1), lambda s, i: (s * steps_per_split + i, 0)),
    ]
    operands = [pred, target2d]
    if has_weight:
        in_specs.append(pl.BlockSpec((1, C), lambda s, i: (0, 0)))
        operands.append(jnp.asarray(weight, jnp.float32).reshape(1, C))

    out = pl.pallas_call(
        kernel,
        out_shape=jax.ShapeDtypeStruct((8, 128 * num_splits), jnp.float32),
        grid_spec=pltpu.PrefetchScalarGridSpec(
            num_scalar_prefetch=0,
            grid=(num_splits, steps_per_split),
            in_specs=in_specs,
            out_specs=pl.BlockSpec((8, 128), lambda s, i: (0, s)),
            scratch_shapes=[pltpu.VMEM((block_n, 1), jnp.float32)],
        ),
        compiler_params=pltpu.CompilerParams(
            dimension_semantics=("parallel", "arbitrary"),
            vmem_limit_bytes=vmem_limit),
    )(*operands)

    # one (8,128) block per split; lane 0 of each block holds its partial mean
    return jnp.sum(out[0, ::128])


def _reference(pred, target, *, num_classes, smoothing, weight):
    logp = jax.nn.log_softmax(pred.astype(jnp.float32), axis=-1)
    if weight is not None:
        logp = logp * weight[None, :]
    confidence = 1.0 - smoothing
    true_dist = jnp.full_like(logp, smoothing / max(num_classes - 1, 1))
    onehot = jax.nn.one_hot(target, num_classes, dtype=bool)
    true_dist = jnp.where(onehot, confidence, true_dist)
    return jnp.mean(jnp.sum(-true_dist * logp, axis=-1))


if __name__ == "__main__":
    key = jax.random.PRNGKey(0)
    k1, k2, k3 = jax.random.split(key, 3)

    N, C = 16, 32
    smoothing = 0.1

    pred = jax.random.normal(k1, (N, C), dtype=jnp.float32) * 2.0
    target = jax.random.randint(k2, (N,), 0, C, dtype=jnp.int32)
    weight = jax.random.uniform(k3, (C,), dtype=jnp.float32) + 0.5

    loss = label_smoothing_loss(
        pred, target, num_classes=C, smoothing=smoothing, weight=weight)
    loss = jax.block_until_ready(loss)

    ref = _reference(pred, target, num_classes=C, smoothing=smoothing,
                     weight=weight)
    assert jnp.allclose(loss, ref, rtol=1e-5, atol=1e-5), (loss, ref)

    # also exercise the no-weight, smoothing=0 (one-hot) path with padding
    N2 = 20  # not a multiple of the tile -> exercises the masked last tile
    pred2 = jax.random.normal(k1, (N2, C), dtype=jnp.bfloat16)
    target2 = jax.random.randint(k2, (N2,), 0, C, dtype=jnp.int32)
    loss2 = jax.block_until_ready(
        label_smoothing_loss(pred2, target2, num_classes=C, smoothing=0.0))
    ref2 = _reference(pred2, target2, num_classes=C, smoothing=0.0, weight=None)
    assert jnp.allclose(loss2, ref2, rtol=2e-2, atol=2e-2), (loss2, ref2)

    print("KERNEL_OK")
</pallas_src>

<mosaic_0001>
module attributes {stable_mosaic.version = 11 : i64} {
  func.func @_label_smoothing_kernel(%arg0: i32, %arg1: i32, %arg2: memref<16x32xf32, #tpu.memory_space<vmem>>, %arg3: memref<16x1xi32, #tpu.memory_space<vmem>>, %arg4: memref<1x32xf32, #tpu.memory_space<vmem>>, %arg5: memref<8x128xf32, #tpu.memory_space<vmem>>, %arg6: memref<16x1xf32, #tpu.memory_space<vmem>>) attributes {dimension_semantics = [#tpu.dimension_semantics<parallel>, #tpu.dimension_semantics<arbitrary>], iteration_bounds = array<i64: 1, 1>, scalar_prefetch = 0 : i64, scratch_operands = 1 : i64, tpu.core_type = #tpu.core_type<tc>, window_params = [{transform_indices = @transform_0, window_bounds = array<i64: 16, 32>}, {transform_indices = @transform_1, window_bounds = array<i64: 16, 1>}, {pipeline_mode = #tpu.pipeline_mode<synchronous>, transform_indices = @transform_2, window_bounds = array<i64: 1, 32>}, {transform_indices = @transform_3, window_bounds = array<i64: 8, 128>}]} {
    %c0_i32 = arith.constant 0 : i32
    %0 = arith.cmpi eq, %arg1, %c0_i32 : i32
    %1 = arith.extui %0 : i1 to i32
    %c0_i32_0 = arith.constant 0 : i32
    %2 = arith.cmpi ne, %1, %c0_i32_0 : i32
    scf.if %2 {
      %cst_21 = arith.constant 0.000000e+00 : f32
      %50 = vector.broadcast %cst_21 : f32 to vector<16x1xf32>
      %c0_22 = arith.constant 0 : index
      %c0_23 = arith.constant 0 : index
      %51 = vector.load %arg6[%c0_22, %c0_23] : memref<16x1xf32, #tpu.memory_space<vmem>>, vector<16x1xf32>
      tpu.vector_store %arg6[%c0_22, %c0_23], %50 {strides = array<i32>} : memref<16x1xf32, #tpu.memory_space<vmem>>, vector<16x1xf32>,
    } else {
    }
    %c0 = arith.constant 0 : index
    %c0_1 = arith.constant 0 : index
    %3 = vector.load %arg2[%c0, %c0_1] : memref<16x32xf32, #tpu.memory_space<vmem>>, vector<16x32xf32>
    %cst = arith.constant dense<0xFF800000> : vector<16xf32>
    %4 = vector.multi_reduction <maximumf>, %3, %cst [1] : vector<16x32xf32> to vector<16xf32>
    %5 = vector.shape_cast %4 : vector<16xf32> to vector<16x1xf32>
    %6 = vector.broadcast %5 : vector<16x1xf32> to vector<16x32xf32>
    %7 = arith.subf %3, %6 : vector<16x32xf32>
    %8 = math.exp %7 : vector<16x32xf32>
    %cst_2 = arith.constant dense<0.000000e+00> : vector<16xf32>
    %9 = vector.multi_reduction <add>, %8, %cst_2 [1] : vector<16x32xf32> to vector<16xf32>
    %10 = vector.shape_cast %9 : vector<16xf32> to vector<16x1xf32>
    %11 = math.log %10 : vector<16x1xf32>
    %12 = arith.addf %11, %5 : vector<16x1xf32>
    %13 = vector.broadcast %12 : vector<16x1xf32> to vector<16x32xf32>
    %14 = arith.subf %3, %13 : vector<16x32xf32>
    %c0_3 = arith.constant 0 : index
    %c0_4 = arith.constant 0 : index
    %15 = vector.load %arg4[%c0_3, %c0_4] : memref<1x32xf32, #tpu.memory_space<vmem>>, vector<1x32xf32>
    %16 = vector.broadcast %15 : vector<1x32xf32> to vector<16x32xf32>
    %17 = arith.mulf %14, %16 : vector<16x32xf32>
    %18 = tpu.iota {dimensions = array<i32: 1>} : vector<1x32xi32>
    %c0_5 = arith.constant 0 : index
    %c0_6 = arith.constant 0 : index
    %19 = vector.load %arg3[%c0_5, %c0_6] : memref<16x1xi32, #tpu.memory_space<vmem>>, vector<16x1xi32>
    %20 = vector.broadcast %18 : vector<1x32xi32> to vector<16x32xi32>
    %21 = vector.broadcast %19 : vector<16x1xi32> to vector<16x32xi32>
    %22 = arith.cmpi eq, %20, %21 : vector<16x32xi32>
    %cst_7 = arith.constant 0.000000e+00 : f32
    %23 = vector.broadcast %cst_7 : f32 to vector<16x32xf32>
    %24 = arith.select %22, %17, %23 : vector<16x32xi1>, vector<16x32xf32>
    %cst_8 = arith.constant dense<0.000000e+00> : vector<16xf32>
    %25 = vector.multi_reduction <add>, %24, %cst_8 [1] : vector<16x32xf32> to vector<16xf32>
    %26 = vector.shape_cast %25 : vector<16xf32> to vector<16x1xf32>
    %cst_9 = arith.constant dense<0.000000e+00> : vector<16xf32>
    %27 = vector.multi_reduction <add>, %17, %cst_9 [1] : vector<16x32xf32> to vector<16xf32>
    %28 = vector.shape_cast %27 : vector<16xf32> to vector<16x1xf32>
    %cst_10 = arith.constant 0.0032258064 : f32
    %29 = vector.broadcast %cst_10 : f32 to vector<16x1xf32>
    %30 = arith.mulf %29, %28 : vector<16x1xf32>
    %cst_11 = arith.constant 0.896774172 : f32
    %31 = vector.broadcast %cst_11 : f32 to vector<16x1xf32>
    %32 = arith.mulf %31, %26 : vector<16x1xf32>
    %33 = arith.addf %30, %32 : vector<16x1xf32>
    %cst_12 = arith.constant 0.000000e+00 : f32
    %34 = vector.broadcast %cst_12 : f32 to vector<16x1xf32>
    %35 = arith.subf %34, %33 : vector<16x1xf32>
    %c1_i32 = arith.constant 1 : i32
    %36 = arith.muli %arg0, %c1_i32 : i32
    %37 = arith.addi %36, %arg1 : i32
    %c16_i32 = arith.constant 16 : i32
    %38 = arith.muli %37, %c16_i32 : i32
    %c16_i32_13 = arith.constant 16 : i32
    %39 = arith.addi %38, %c16_i32_13 : i32
    %c16_i32_14 = arith.constant 16 : i32
    %40 = arith.cmpi sle, %39, %c16_i32_14 : i32
    %41 = arith.extui %40 : i1 to i32
    %c0_i32_15 = arith.constant 0 : i32
    %42 = arith.cmpi ne, %41, %c0_i32_15 : i32
    scf.if %42 {
      %c0_21 = arith.constant 0 : index
      %c0_22 = arith.constant 0 : index
      %50 = vector.load %arg6[%c0_21, %c0_22] : memref<16x1xf32, #tpu.memory_space<vmem>>, vector<16x1xf32>
      %51 = arith.addf %50, %35 : vector<16x1xf32>
      %c0_23 = arith.constant 0 : index
      %c0_24 = arith.constant 0 : index
      %52 = vector.load %arg6[%c0_23, %c0_24] : memref<16x1xf32, #tpu.memory_space<vmem>>, vector<16x1xf32>
      tpu.vector_store %arg6[%c0_23, %c0_24], %51 {strides = array<i32>} : memref<16x1xf32, #tpu.memory_space<vmem>>, vector<16x1xf32>,
    } else {
    }
    %c16_i32_16 = arith.constant 16 : i32
    %43 = arith.addi %38, %c16_i32_16 : i32
    %c16_i32_17 = arith.constant 16 : i32
    %44 = arith.cmpi sgt, %43, %c16_i32_17 : i32
    %45 = arith.extui %44 : i1 to i32
    %c0_i32_18 = arith.constant 0 : i32
    %46 = arith.cmpi ne, %45, %c0_i32_18 : i32
    scf.if %46 {
      %50 = tpu.iota {dimensions = array<i32: 0>} : vector<16x1xi32>
      %51 = vector.broadcast %38 : i32 to vector<16x1xi32>
      %52 = arith.addi %51, %50 : vector<16x1xi32>
      %c0_21 = arith.constant 0 : index
      %c0_22 = arith.constant 0 : index
      %53 = vector.load %arg6[%c0_21, %c0_22] : memref<16x1xf32, #tpu.memory_space<vmem>>, vector<16x1xf32>
      %c16_i32_23 = arith.constant 16 : i32
      %54 = vector.broadcast %c16_i32_23 : i32 to vector<16x1xi32>
      %55 = arith.cmpi slt, %52, %54 : vector<16x1xi32>
      %cst_24 = arith.constant 0.000000e+00 : f32
      %56 = vector.broadcast %cst_24 : f32 to vector<16x1xf32>
      %57 = arith.select %55, %35, %56 : vector<16x1xi1>, vector<16x1xf32>
      %58 = arith.addf %53, %57 : vector<16x1xf32>
      %c0_25 = arith.constant 0 : index
      %c0_26 = arith.constant 0 : index
      %59 = vector.load %arg6[%c0_25, %c0_26] : memref<16x1xf32, #tpu.memory_space<vmem>>, vector<16x1xf32>
      tpu.vector_store %arg6[%c0_25, %c0_26], %58 {strides = array<i32>} : memref<16x1xf32, #tpu.memory_space<vmem>>, vector<16x1xf32>,
    } else {
    }
    %c0_i32_19 = arith.constant 0 : i32
    %47 = arith.cmpi eq, %arg1, %c0_i32_19 : i32
    %48 = arith.extui %47 : i1 to i32
    %c0_i32_20 = arith.constant 0 : i32
    %49 = arith.cmpi ne, %48, %c0_i32_20 : i32
    scf.if %49 {
      %c0_21 = arith.constant 0 : index
      %c0_22 = arith.constant 0 : index
      %50 = vector.load %arg6[%c0_21, %c0_22] : memref<16x1xf32, #tpu.memory_space<vmem>>, vector<16x1xf32>
      %51 = vector.shape_cast %50 : vector<16x1xf32> to vector<1x16x1xf32>
      %cst_23 = arith.constant dense<0.000000e+00> : vector<1xf32>
      %52 = vector.multi_reduction <add>, %51, %cst_23 [1, 2] : vector<1x16x1xf32> to vector<1xf32>
      %53 = vector.shape_cast %52 : vector<1xf32> to vector<1x1x1xf32>
      %54 = vector.extract %53[0, 0, 0] : f32 from vector<1x1x1xf32>
      %cst_24 = arith.constant 1.600000e+01 : f32
      %55 = arith.divf %54, %cst_24 : f32
      %56 = vector.broadcast %55 : f32 to vector<8x128xf32>
      %c0_25 = arith.constant 0 : index
      %c0_26 = arith.constant 0 : index
      %57 = vector.load %arg5[%c0_25, %c0_26] : memref<8x128xf32, #tpu.memory_space<vmem>>, vector<8x128xf32>
      tpu.vector_store %arg5[%c0_25, %c0_26], %56 {strides = array<i32>} : memref<8x128xf32, #tpu.memory_space<vmem>>, vector<8x128xf32>,
    } else {
    }
    return
  }
  func.func @transform_0(%arg0: i32, %arg1: i32) -> (i32, i32) {
    %c1_i32 = arith.constant 1 : i32
    %0 = arith.muli %arg0, %c1_i32 : i32
    %1 = arith.addi %0, %arg1 : i32
    %c0_i32 = arith.constant 0 : i32
    %c0_i32_0 = arith.constant 0 : i32
    return %1, %c0_i32 : i32, i32
  }
  func.func @transform_1(%arg0: i32, %arg1: i32) -> (i32, i32) {
    %c1_i32 = arith.constant 1 : i32
    %0 = arith.muli %arg0, %c1_i32 : i32
    %1 = arith.addi %0, %arg1 : i32
    %c0_i32 = arith.constant 0 : i32
    %c0_i32_0 = arith.constant 0 : i32
    return %1, %c0_i32 : i32, i32
  }
  func.func @transform_2(%arg0: i32, %arg1: i32) -> (i32, i32) {
    %c0_i32 = arith.constant 0 : i32
    %c0_i32_0 = arith.constant 0 : i32
    %c0_i32_1 = arith.constant 0 : i32
    return %c0_i32, %c0_i32_0 : i32, i32
  }
  func.func @transform_3(%arg0: i32, %arg1: i32) -> (i32, i32) {
    %c0_i32 = arith.constant 0 : i32
    %c0_i32_0 = arith.constant 0 : i32
    return %c0_i32, %arg0 : i32, i32
  }
}

</mosaic_0001>

<bundles_post_ra>
// kernel: tpu_custom_call.1
= control target key start
LH: loop header
LB: loop body
LE: loop exit
PB: predicated region body
PF: predicated region fallthrough
CT: control target
= control target key end

     0   :  { %vm68_vm0 = vcmask 261120   ;;  %s315_s0 = inlined_call_operand.vmem [shape: f32[16,32], index: 0, kind: input, shape index: {}]   ;;  %s316_s1 = inlined_call_operand.vmem [shape: s32[16,1], index: 1, kind: input, shape index: {}]   ;;  %s317_s2 = inlined_call_operand.vmem [shape: f32[1,32], index: 2, kind: input, shape index: {}]   ;;  %s318_s3 = inlined_call_operand.hbm [shape: f32[8,128], index: 3, kind: output, shape index: {}]  }
   0x1   :  { %v66_v0 = vld [vmem:[%s315_s0] sm:$0xff]  ;;  %v67_v1 = vld [vmem:[%s315_s0 + $0x8] sm:$0xff] }
   0x2   :  { %8 = vsyncpa [#allocation4], 0  ;;  %v69_v2 = vsel %vm68_vm0, %v66_v0, -inf  ;;  %v72_v3 = vsel %vm68_vm0, %v67_v1, -inf  ;;  %v106_v4 = vld [vmem:[%s316_s1] sm:$0xff]  ;;  %v260_v5 = vmov 0   ;;  %v104_v19 = vlaneseq }
   0x3   :  { %70 = vmax.xlane.f32.xlu0 %v69_v2  ;;  %229 = vset.pattern.permute.xlu1 %v260_v5  ;;  %v107_v16 = vld [vmem:[%s316_s1 + $0x8] sm:$0xff]  ;;  %v222_v26 = vld [vmem:[%s317_s2] ss:$0 sm:$0xff]  ;;  %vm63_vm3 = vcmask 7168   ;;  %v261_v40 = vmov 0.0   ;;  %s262_s1 = smov [#allocation3]  }
   0x4   :  { %228 = vset.pattern.permute.xlu0 %v260_v5  ;;  %v105_v22 = vand.u32 127, %v104_v19  ;;  %64 = vst.msk [vmem:[#allocation2] sm:$0xff] %vm63_vm3, %v261_v40  ;;  %65 = vst.msk [vmem:[#allocation2 + $0x8] sm:$0xff] %vm63_vm3, %v261_v40  ;;  %s202_s2 = sshll.u32 %s262_s1, 4  ;;  %s203_s2 = int_to_ptr.vmem [resolvable:$true] %s202_s2 }
   0x5   :  { %s238_s23 = scalar_lea.vmem %s203_s2, 128  ;;  %p243_p1 = scmp.lt.s32.totalorder %s203_s2, %s203_s2 }
   0x6   :  { %p239_p0 = scmp.ne.s32.totalorder %s203_s2, %s238_s23  ;;  %p244_p2 = scmp.lt.s32.totalorder %s238_s23, %s238_s23 }
   0x7   :  { %73 = vmax.xlane.f32.xlu0 %v72_v3 }
   0x8   :  { %p245_p3 = por %p244_p2, %p243_p1 }
   0xa   :  { %p246_p4 = pnand %p245_p3, %p239_p0 }
   0xb   :  { %v145_v47 = vld [vmem:[#allocation2] sm:$0xff]  ;;  %v146_v54 = vld [vmem:[#allocation2 + $0x8] sm:$0xff] }
  0x1d   :  { %109 = vperm.xlu0 %228, %v106_v4  }
  0x8c   :  { %v71_v6 = vpop.xlane.xlu0 %70 }
  0x8d   :  { %v75_v7 = vsub.f32 %v66_v0, %v71_v6 }
  0x8f   :  { %v77_v8 = vmul.f32 1.442695, %v75_v7 }
  0x90   :  { %v74_v9 = vpop.xlane.xlu0 %73 }
  0x91   :  { %230 = vpow2.f32 %v77_v8  ;;  %v76_v10 = vsub.f32 %v67_v1, %v74_v9 }
  0x93   :  { %v79_v11 = vmul.f32 1.442695, %v76_v10 }
  0x95   :  { %232 = vpow2.f32 %v79_v11 }
  0x98   :  { %v110_v24 = vpop.permute.xlu0 %109 }
  0x99   :  { %vm114_vm1 = vcmp.eq.s32.totalorder %v105_v22, %v110_v24 }
  0x9e   :  { %v231_v12 = vpop.eup %230 }
  0x9f   :  { %v81_v13 = vsel %vm68_vm0, %v231_v12, 0.0 }
  0xa0   :  { %82 = vadd.xlane.f32.xlu1 %v81_v13 }
  0xa2   :  { %v233_v14 = vpop.eup %232 }
  0xa3   :  { %v84_v15 = vsel %vm68_vm0, %v233_v14, 0.0 }
  0xa4   :  { %85 = vadd.xlane.f32.xlu1 %v84_v15 }
  0xb5   :  { %112 = vperm.xlu1 %229, %v107_v16  }
 0x129   :  { %v83_v17 = vpop.xlane.xlu1 %82 }
 0x12a   :  { %234 = vlog2.f32 %v83_v17 }
 0x12d   :  { %v86_v18 = vpop.xlane.xlu1 %85 }
 0x12e   :  { %236 = vlog2.f32 %v86_v18 }
 0x131   :  { %v113_v30 = vpop.permute.xlu1 %112 }
 0x132   :  { %vm115_vm2 = vcmp.eq.s32.totalorder %v105_v22, %v113_v30 }
 0x137   :  { %v235_v20 = vpop.eup %234 }
 0x138   :  { %v88_v21 = vmul.f32 0.6931472, %v235_v20 }
 0x13a   :  { %v91_v23 = vadd.f32 %v88_v21, %v71_v6 }
 0x13b   :  { %v237_v25 = vpop.eup %236 }
 0x13c   :  { %v90_v27 = vmul.f32 0.6931472, %v237_v25  ;;  %v93_v28 = vsub.f32 %v66_v0, %v91_v23 }
 0x13e   :  { %v92_v29 = vadd.f32 %v90_v27, %v74_v9  ;;  %v102_v31 = vmul.f32 %v222_v26, %v93_v28 }
 0x140   :  { %v116_v32 = vsel %vm114_vm1, %v102_v31, 0.0  ;;  %v94_v33 = vsub.f32 %v67_v1, %v92_v29  ;;  %v124_v38 = vsel %vm68_vm0, %v102_v31, 0.0 }
 0x141   :  { %v118_v34 = vsel %vm68_vm0, %v116_v32, 0.0 }
 0x142   :  { %119 = vadd.xlane.f32.xlu1 %v118_v34  ;;  %v103_v35 = vmul.f32 %v222_v26, %v94_v33 }
 0x144   :  { %v117_v36 = vsel %vm115_vm2, %v103_v35, 0.0  ;;  %v127_v39 = vsel %vm68_vm0, %v103_v35, 0.0 }
 0x145   :  { %v121_v37 = vsel %vm68_vm0, %v117_v36, 0.0 }
 0x146   :  { %122 = vadd.xlane.f32.xlu0 %v121_v37  ;;  %125 = vadd.xlane.f32.xlu1 %v124_v38 }
 0x14a   :  { %128 = vadd.xlane.f32.xlu1 %v127_v39 }
 0x1cb   :  { %v120_v41 = vpop.xlane.xlu1 %119 }
 0x1cc   :  { %v132_v43 = vmul.f32 0.8967742, %v120_v41 }
 0x1cf   :  { %v126_v42 = vpop.xlane.xlu1 %125  ;;  %v123_v45 = vpop.xlane.xlu0 %122 }
 0x1d0   :  { %v130_v44 = vmul.f32 0.0032258064, %v126_v42  ;;  %v133_v50 = vmul.f32 0.8967742, %v123_v45 }
 0x1d2   :  { %v134_v46 = vadd.f32 %v132_v43, %v130_v44 }
 0x1d3   :  { %v129_v48 = vpop.xlane.xlu1 %128 }
 0x1d4   :  { %v136_v49 = vsub.f32 0.0, %v134_v46  ;;  %v131_v51 = vmul.f32 0.0032258064, %v129_v48 }
 0x1d6   :  { %v147_v52 = vadd.f32 %v145_v47, %v136_v49  ;;  %v135_v53 = vadd.f32 %v133_v50, %v131_v51 }
 0x1d8   :  { %150 = vst.msk [vmem:[#allocation2] sm:$0xff] %vm63_vm3, %v147_v52  ;;  %v137_v55 = vsub.f32 0.0, %v135_v53 }
 0x1da   :  { %v148_v56 = vadd.f32 %v146_v54, %v137_v55 }
 0x1dc   :  { %151 = vst.msk [vmem:[#allocation2 + $0x8] sm:$0xff] %vm63_vm3, %v148_v56 }
 0x1df   :  { %v176_v57 = vld [vmem:[#allocation2] sm:$0xff] }
 0x1e0   :  { %v179_v59 = vsel %vm63_vm3, %v176_v57, 0.0 }
 0x1e3   :  { %v177_v58 = vld [vmem:[#allocation2 + $0x8] sm:$0xff] }
 0x1e4   :  { %v180_v60 = vsel %vm63_vm3, %v177_v58, 0.0 }
 0x1e5   :  { %v181_v61 = vadd.f32 %v180_v60, %v179_v59 }
 0x1e7   :  { %182 = vadd.xlane.f32.xlu1 %v181_v61 }
 0x270   :  { %v183_v62 = vpop.xlane.xlu1 %182 }
 0x271   :  { %v184_v63 = vrot.slane %v183_v62, 4 }
 0x273   :  { %v185_v0 = vadd.f32 %v184_v63, %v183_v62 }
 0x275   :  { %v186_v1 = vrot.slane %v185_v0, 2 }
 0x277   :  { %v187_v2 = vadd.f32 %v186_v1, %v185_v0 }
 0x279   :  { %v188_v3 = vrot.slane %v187_v2, 1 }
 0x27b   :  { %v189_v4 = vadd.f32 %v188_v3, %v187_v2 }
 0x27d   :  { %223 = vpush %v189_v4 }
 0x2ae   :  { %s224_s21 = spop %223 }
 0x2af   :  { %s193_s22 = smul.f32 0.0625, %s224_s21 }
 0x2b1   :  { %v194_v5 = vstv %s193_s22 }
 0x2b2   :  { %195 = vst [vmem:[#allocation3] sm:$0xff] %v194_v5 }
 0x2b3   :  { %249 = shalt.err (!%p246_p4)
}
 0x2b4   :  { %205 = dma.vmem_to_hbm [thread:$0]  %s203_s2, 128, %s318_s3, [#allocation4]  }
 0x2b5   :  { %258 = dma.done.wait [#allocation4], 128  }
 0x2b6   :  { %259 = vsyncadd [#allocation4], 4294967168 }
 0x2b7   :  { %209 = vsyncpa [#allocation4], 1 }

</bundles_post_ra>
